<compile_context>
chip_gen: v6e
topology: v6e:2x2x1
jax: 0.10.0
libtpu: 0.0.40
codegen_flags: <defaults>
</compile_context>

<pallas_src>
import jax
import jax.numpy as jnp
from jax.experimental import pallas as pl
from jax.experimental.pallas import tpu as pltpu


def _round_up(x, m):
    return ((x + m - 1) // m) * m


def _sigmoid(x):
    # sigmoid(x) == 0.5 * (1 + tanh(x / 2)): one EUP transcendental, no overflow.
    return 0.5 * (1.0 + jnp.tanh(0.5 * x))


# ----------------------------------------------------------------------------
# forward(users, items): sigmoid(sum(E_u[users] * E_i[items], dim=1))
# ----------------------------------------------------------------------------
def _bprmf_forward_kernel(u_ref, i_ref, out_ref):
    # u_ref, i_ref: (D, TB) f32 tiles (batch on the lane axis)
    # out_ref:      (1, TB) f32 lane-dense score chunk
    prod = u_ref[...] * i_ref[...]                # VPU elementwise
    s = jnp.sum(prod, axis=0, keepdims=True)      # sublane (D) reduction -> (1, TB)
    out_ref[...] = _sigmoid(s)


def bprmf_forward(emb_user, emb_item, users, items, *, tb=1024):
    """sigmoid(sum(emb_user[users] * emb_item[items], axis=1)) -> [B] f32."""
    users = users.astype(jnp.int32)
    items = items.astype(jnp.int32)
    # Embedding gathers: dense, vectorized XLA gather in the wrapper (far
    # cheaper than one 256-byte DMA descriptor per row inside the kernel).
    # Transposed so the batch lands on the lane axis of the kernel tiles.
    u = emb_user[users].astype(jnp.float32).T      # (D, B)
    i = emb_item[items].astype(jnp.float32).T      # (D, B)
    D, B = u.shape

    tb = min(tb, _round_up(B, 128))
    Bp = _round_up(B, tb)
    if Bp != B:
        u = jnp.pad(u, ((0, 0), (0, Bp - B)))
        i = jnp.pad(i, ((0, 0), (0, Bp - B)))

    out = pl.pallas_call(
        _bprmf_forward_kernel,
        out_shape=jax.ShapeDtypeStruct((1, Bp), jnp.float32),
        grid_spec=pltpu.PrefetchScalarGridSpec(
            num_scalar_prefetch=0,
            grid=(Bp // tb,),
            in_specs=[
                pl.BlockSpec((D, tb), lambda b: (0, b)),
                pl.BlockSpec((D, tb), lambda b: (0, b)),
            ],
            out_specs=pl.BlockSpec((1, tb), lambda b: (0, b)),
        ),
        compiler_params=pltpu.CompilerParams(
            dimension_semantics=("parallel",)),
    )(u, i)
    return out[0, :B]


# ----------------------------------------------------------------------------
# get_users_rating(users): sigmoid(E_u[users] @ E_i.T) -> [B, n_item]
# ----------------------------------------------------------------------------
def _bprmf_rating_kernel(u_ref, it_ref, out_ref):
    # u_ref:   (TU, D) bf16 user-embedding tile
    # it_ref:  (TN, D) bf16 item-embedding tile (original layout, no transpose)
    # out_ref: (TU, TN) f32 lane-dense rating tile
    s = jax.lax.dot_general(
        u_ref[...], it_ref[...],
        dimension_numbers=(((1,), (1,)), ((), ())),   # contract the two D axes on the MXU
        preferred_element_type=jnp.float32)           # f32 accumulation
    out_ref[...] = _sigmoid(s)
    # TODO(synk): make the sigmoid optional for pure top-k ranking (it is monotonic).


def bprmf_users_rating(emb_user, emb_item, users, *, tu=256, tn=512,
                       compute_dtype=jnp.bfloat16):
    """sigmoid(emb_user[users] @ emb_item.T) -> [B, n_item] f32."""
    users = users.astype(jnp.int32)
    u = emb_user[users].astype(compute_dtype)      # (B, D) gathered user rows
    it = emb_item.astype(compute_dtype)            # (N, D) item table (kept untransposed)
    B, D = u.shape
    N = it.shape[0]

    tu = min(tu, _round_up(B, 8))
    tn = min(tn, _round_up(N, 128))
    Bp = _round_up(B, tu)
    Np = _round_up(N, tn)
    if Bp != B:
        u = jnp.pad(u, ((0, Bp - B), (0, 0)))
    if Np != N:
        it = jnp.pad(it, ((0, Np - N), (0, 0)))

    out = pl.pallas_call(
        _bprmf_rating_kernel,
        out_shape=jax.ShapeDtypeStruct((Bp, Np), jnp.float32),
        grid_spec=pltpu.PrefetchScalarGridSpec(
            num_scalar_prefetch=0,
            grid=(Bp // tu, Np // tn),
            in_specs=[
                # user tile: constant over the inner (item) axis -> fetched once
                pl.BlockSpec((tu, D), lambda ui, ni: (ui, 0)),
                # item tile: streamed (double-buffered) over the inner axis
                pl.BlockSpec((tn, D), lambda ui, ni: (ni, 0)),
            ],
            out_specs=pl.BlockSpec((tu, tn), lambda ui, ni: (ui, ni)),
        ),
        compiler_params=pltpu.CompilerParams(
            dimension_semantics=("parallel", "parallel")),
    )(u, it)
    return out[:B, :N]


# ----------------------------------------------------------------------------
# Self-contained test
# ----------------------------------------------------------------------------
if __name__ == "__main__":
    n_user, n_item, embed_size = 48, 80, 64
    batch = 8

    key = jax.random.PRNGKey(0)
    k_u, k_i, k_users, k_items = jax.random.split(key, 4)

    # "using Normal distribution N(0,1) initialization for BPRMF"
    emb_user = jax.random.normal(k_u, (n_user, embed_size), jnp.float32)
    emb_item = jax.random.normal(k_i, (n_item, embed_size), jnp.float32)
    users = jax.random.randint(k_users, (batch,), 0, n_user, dtype=jnp.int32)
    items = jax.random.randint(k_items, (batch,), 0, n_item, dtype=jnp.int32)

    # forward()
    fwd = jax.jit(bprmf_forward)
    scores = fwd(emb_user, emb_item, users, items)
    jax.block_until_ready(scores)
    assert scores.shape == (batch,) and scores.dtype == jnp.float32
    ref_scores = jax.nn.sigmoid(jnp.sum(emb_user[users] * emb_item[items], axis=1))
    assert jnp.allclose(scores, ref_scores, atol=1e-4), (scores, ref_scores)

    # get_users_rating()
    rate = jax.jit(bprmf_users_rating)
    ratings = rate(emb_user, emb_item, users)
    jax.block_until_ready(ratings)
    assert ratings.shape == (batch, n_item) and ratings.dtype == jnp.float32
    ref_ratings = jax.nn.sigmoid(
        jnp.dot(emb_user[users], emb_item.T, precision=jax.lax.Precision.HIGHEST))
    # loose tolerance: kernel uses bf16 inputs with f32 MXU accumulation
    assert jnp.allclose(ratings, ref_ratings, atol=5e-2), "rating mismatch"

    print("KERNEL_OK")
</pallas_src>

<mosaic_0001>
module attributes {stable_mosaic.version = 11 : i64} {
  func.func @_bprmf_forward_kernel(%arg0: i32, %arg1: memref<64x128xf32, #tpu.memory_space<vmem>>, %arg2: memref<64x128xf32, #tpu.memory_space<vmem>>, %arg3: memref<1x128xf32, #tpu.memory_space<vmem>>) attributes {dimension_semantics = [#tpu.dimension_semantics<parallel>], iteration_bounds = array<i64: 1>, scalar_prefetch = 0 : i64, scratch_operands = 0 : i64, tpu.core_type = #tpu.core_type<tc>, window_params = [{transform_indices = @transform_0, window_bounds = array<i64: 64, 128>}, {transform_indices = @transform_1, window_bounds = array<i64: 64, 128>}, {transform_indices = @transform_2, window_bounds = array<i64: 1, 128>}]} {
    %c0 = arith.constant 0 : index
    %c0_0 = arith.constant 0 : index
    %0 = vector.load %arg1[%c0, %c0_0] : memref<64x128xf32, #tpu.memory_space<vmem>>, vector<64x128xf32>
    %c0_1 = arith.constant 0 : index
    %c0_2 = arith.constant 0 : index
    %1 = vector.load %arg2[%c0_1, %c0_2] : memref<64x128xf32, #tpu.memory_space<vmem>>, vector<64x128xf32>
    %2 = arith.mulf %0, %1 : vector<64x128xf32>
    %cst = arith.constant dense<0.000000e+00> : vector<128xf32>
    %3 = vector.multi_reduction <add>, %2, %cst [0] : vector<64x128xf32> to vector<128xf32>
    %4 = vector.shape_cast %3 : vector<128xf32> to vector<1x128xf32>
    %cst_3 = arith.constant 5.000000e-01 : f32
    %5 = vector.broadcast %cst_3 : f32 to vector<1x128xf32>
    %6 = arith.mulf %5, %4 : vector<1x128xf32>
    %7 = math.tanh %6 : vector<1x128xf32>
    %cst_4 = arith.constant 1.000000e+00 : f32
    %8 = vector.broadcast %cst_4 : f32 to vector<1x128xf32>
    %9 = arith.addf %8, %7 : vector<1x128xf32>
    %cst_5 = arith.constant 5.000000e-01 : f32
    %10 = vector.broadcast %cst_5 : f32 to vector<1x128xf32>
    %11 = arith.mulf %10, %9 : vector<1x128xf32>
    %c0_6 = arith.constant 0 : index
    %c0_7 = arith.constant 0 : index
    %12 = vector.load %arg3[%c0_6, %c0_7] : memref<1x128xf32, #tpu.memory_space<vmem>>, vector<1x128xf32>
    tpu.vector_store %arg3[%c0_6, %c0_7], %11 {strides = array<i32>} : memref<1x128xf32, #tpu.memory_space<vmem>>, vector<1x128xf32>,
    return
  }
  func.func @transform_0(%arg0: i32) -> (i32, i32) {
    %c0_i32 = arith.constant 0 : i32
    %c0_i32_0 = arith.constant 0 : i32
    return %c0_i32, %arg0 : i32, i32
  }
  func.func @transform_1(%arg0: i32) -> (i32, i32) {
    %c0_i32 = arith.constant 0 : i32
    %c0_i32_0 = arith.constant 0 : i32
    return %c0_i32, %arg0 : i32, i32
  }
  func.func @transform_2(%arg0: i32) -> (i32, i32) {
    %c0_i32 = arith.constant 0 : i32
    %c0_i32_0 = arith.constant 0 : i32
    return %c0_i32, %arg0 : i32, i32
  }
}

</mosaic_0001>

<bundles_post_ra>
// kernel: bprmf_forward.1
= control target key start
LH: loop header
LB: loop body
LE: loop exit
PB: predicated region body
PF: predicated region fallthrough
CT: control target
= control target key end

     0   :  { %s125_s0 = inlined_call_operand.vmem [shape: f32[64,128], index: 0, kind: input, shape index: {}]   ;;  %s126_s1 = inlined_call_operand.vmem [shape: f32[64,128], index: 1, kind: input, shape index: {}]   ;;  %s127_s2 = inlined_call_operand.vmem [shape: f32[1,128], index: 2, kind: output, shape index: {}]  }
   0x1   :  { %v11_v0 = vld [vmem:[%s125_s0] sm:$0xff]  ;;  %v12_v1 = vld [vmem:[%s125_s0 + $0x8] sm:$0xff]  ;;  %v13_v2 = vld [vmem:[%s125_s0 + $0x10] sm:$0xff] }
   0x2   :  { %v14_v3 = vld [vmem:[%s125_s0 + $0x18] sm:$0xff]  ;;  %v19_v4 = vld [vmem:[%s126_s1] sm:$0xff]  ;;  %v20_v5 = vld [vmem:[%s126_s1 + $0x8] sm:$0xff] }
   0x3   :  { %v21_v6 = vld [vmem:[%s126_s1 + $0x10] sm:$0xff]  ;;  %v22_v7 = vld [vmem:[%s126_s1 + $0x18] sm:$0xff]  ;;  %v27_v8 = vmul.f32 %v19_v4, %v11_v0  ;;  %v28_v9 = vmul.f32 %v20_v5, %v12_v1  ;;  %v15_v11 = vld [vmem:[%s125_s0 + $0x20] sm:$0xff] }
   0x4   :  { %v29_v10 = vmul.f32 %v21_v6, %v13_v2  ;;  %v23_v12 = vld [vmem:[%s126_s1 + $0x20] sm:$0xff]  ;;  %v30_v13 = vmul.f32 %v22_v7, %v14_v3  ;;  %v16_v15 = vld [vmem:[%s125_s0 + $0x28] sm:$0xff]  ;;  %v17_v19 = vld [vmem:[%s125_s0 + $0x30] sm:$0xff] }
   0x5   :  { %v35_v14 = vadd.f32 %v28_v9, %v27_v8  ;;  %v24_v16 = vld [vmem:[%s126_s1 + $0x28] sm:$0xff]  ;;  %v31_v17 = vmul.f32 %v23_v12, %v15_v11  ;;  %v25_v20 = vld [vmem:[%s126_s1 + $0x30] sm:$0xff]  ;;  %v18_v23 = vld [vmem:[%s125_s0 + $0x38] sm:$0xff] }
   0x6   :  { %v32_v21 = vmul.f32 %v24_v16, %v16_v15  ;;  %v26_v24 = vld [vmem:[%s126_s1 + $0x38] sm:$0xff]  ;;  %v33_v25 = vmul.f32 %v25_v20, %v17_v19 }
   0x7   :  { %v36_v18 = vadd.f32 %v35_v14, %v29_v10  ;;  %v34_v27 = vmul.f32 %v26_v24, %v18_v23 }
   0x9   :  { %v37_v22 = vadd.f32 %v36_v18, %v30_v13 }
   0xb   :  { %v38_v26 = vadd.f32 %v37_v22, %v31_v17 }
   0xd   :  { %v39_v28 = vadd.f32 %v38_v26, %v32_v21 }
   0xf   :  { %v40_v29 = vadd.f32 %v39_v28, %v33_v25 }
  0x11   :  { %v41_v30 = vadd.f32 %v40_v29, %v34_v27 }
  0x13   :  { %v42_v31 = vrot.slane %v41_v30, 4 }
  0x15   :  { %v43_v32 = vadd.f32 %v42_v31, %v41_v30 }
  0x17   :  { %v44_v33 = vrot.slane %v43_v32, 2 }
  0x19   :  { %v45_v34 = vadd.f32 %v44_v33, %v43_v32 }
  0x1b   :  { %v46_v35 = vrot.slane %v45_v34, 1 }
  0x1d   :  { %v47_v36 = vadd.f32 %v46_v35, %v45_v34 }
  0x1f   :  { %v48_v37 = vmul.f32 0.5, %v47_v36 }
  0x21   :  { %57 = vtanh.f32 %v48_v37 }
  0x2e   :  { %v58_v38 = vpop.eup %57 }
  0x2f   :  { %v50_v39 = vadd.f32 1.0, %v58_v38 }
  0x31   :  { %v51_v40 = vmul.f32 0.5, %v50_v39 }
  0x33   :  { %52 = vst [vmem:[%s127_s2] sm:$0x1] %v51_v40 }

</bundles_post_ra>
